<compile_context>
chip_gen: v6e
topology: v6e:2x2x1
jax: 0.10.0
libtpu: 0.0.40
codegen_flags: <defaults>
</compile_context>

<pallas_src>
import jax
import jax.numpy as jnp
from jax.experimental import pallas as pl
from jax.experimental.pallas import tpu as pltpu


def _cz_diag(control: int, target: int, num_qubits: int) -> jnp.ndarray:
    """Diagonal of the CZ matrix (+/-1, purely real).

    Same values as BuiltCZ._calculate_matrix's diagonal, but never
    materializes the dense 2^n x 2^n matrix.
    """
    c2 = num_qubits - control - 1
    t2 = num_qubits - target - 1
    dim = 2 ** num_qubits
    idx = jnp.arange(dim, dtype=jnp.int32)
    mask = ((idx & (1 << c2)) != 0) & ((idx & (1 << t2)) != 0)
    return jnp.where(mask, -1.0, 1.0).astype(jnp.float32)


def _cz_kernel(re_ref, im_ref, d_ref, ore_ref, oim_ref):
    # Pure VPU elementwise multiply; diag (1, tn) broadcasts over the rows.
    d = d_ref[...]
    ore_ref[...] = re_ref[...] * d
    oim_ref[...] = im_ref[...] * d


def _pick_tile(n: int, align: int, cap: int) -> int:
    """Largest tile <= cap that divides n and is a multiple of `align`.
    Falls back to the full extent (always legal) when n is not aligned."""
    if n % align != 0 or n <= align:
        return n
    t = min(n, cap)
    t -= t % align
    while n % t != 0:
        t -= align
    return t


def builtcz_forward(state: jnp.ndarray, diag: jnp.ndarray) -> jnp.ndarray:
    """BuiltCZ.forward: state @ diag(d)  ==  state * d (elementwise)."""
    batch, dim = state.shape
    re = jnp.real(state).astype(jnp.float32)
    im = jnp.imag(state).astype(jnp.float32)
    d2 = diag.reshape(1, dim).astype(jnp.float32)

    tb = _pick_tile(batch, 8, 256)      # sublane (row) tile
    tn = _pick_tile(dim, 128, 2048)     # lane tile: big & 128-aligned
    grid = (batch // tb, dim // tn)

    out_re, out_im = pl.pallas_call(
        _cz_kernel,
        out_shape=(
            jax.ShapeDtypeStruct((batch, dim), jnp.float32),
            jax.ShapeDtypeStruct((batch, dim), jnp.float32),
        ),
        grid=grid,
        in_specs=[
            pl.BlockSpec((tb, tn), lambda i, j: (i, j)),
            pl.BlockSpec((tb, tn), lambda i, j: (i, j)),
            pl.BlockSpec((1, tn), lambda i, j: (0, j)),
        ],
        out_specs=(
            pl.BlockSpec((tb, tn), lambda i, j: (i, j)),
            pl.BlockSpec((tb, tn), lambda i, j: (i, j)),
        ),
        compiler_params=pltpu.CompilerParams(
            dimension_semantics=("parallel", "parallel")
        ),
    )(re, im, d2)

    return jax.lax.complex(out_re, out_im).astype(jnp.complex64)


if __name__ == "__main__":
    num_qubits = 7            # dim = 2**7 = 128 -> lane-dense tile
    control, target = 0, 2
    batch = 8

    dim = 2 ** num_qubits
    diag = _cz_diag(control, target, num_qubits)   # (128,) float32, +/-1

    key = jax.random.PRNGKey(0)
    kr, ki = jax.random.split(key)
    state = (
        jax.random.normal(kr, (batch, dim), dtype=jnp.float32)
        + 1j * jax.random.normal(ki, (batch, dim), dtype=jnp.float32)
    ).astype(jnp.complex64)

    out = builtcz_forward(state, diag)
    out = jax.block_until_ready(out)

    # Reference: plain JAX complex matmul, same as torch `state @ self._M`
    # (dense matrix built only here, for verification at this toy size).
    M = jnp.diag(diag).astype(jnp.complex64)
    ref = state @ M
    assert out.shape == (batch, dim) and out.dtype == jnp.complex64
    assert jnp.allclose(out, ref, atol=1e-6, rtol=1e-6)

    print("KERNEL_OK")
</pallas_src>

<mosaic_0001>
module attributes {stable_mosaic.version = 11 : i64} {
  func.func @_cz_kernel(%arg0: i32, %arg1: i32, %arg2: memref<8x128xf32, #tpu.memory_space<vmem>>, %arg3: memref<8x128xf32, #tpu.memory_space<vmem>>, %arg4: memref<1x128xf32, #tpu.memory_space<vmem>>, %arg5: memref<8x128xf32, #tpu.memory_space<vmem>>, %arg6: memref<8x128xf32, #tpu.memory_space<vmem>>) attributes {dimension_semantics = [#tpu.dimension_semantics<parallel>, #tpu.dimension_semantics<parallel>], iteration_bounds = array<i64: 1, 1>, scalar_prefetch = 0 : i64, scratch_operands = 0 : i64, tpu.core_type = #tpu.core_type<tc>, window_params = [{transform_indices = @transform_0, window_bounds = array<i64: 8, 128>}, {transform_indices = @transform_1, window_bounds = array<i64: 8, 128>}, {transform_indices = @transform_2, window_bounds = array<i64: 1, 128>}, {transform_indices = @transform_3, window_bounds = array<i64: 8, 128>}, {transform_indices = @transform_4, window_bounds = array<i64: 8, 128>}]} {
    %c0 = arith.constant 0 : index
    %c0_0 = arith.constant 0 : index
    %0 = vector.load %arg4[%c0, %c0_0] : memref<1x128xf32, #tpu.memory_space<vmem>>, vector<1x128xf32>
    %c0_1 = arith.constant 0 : index
    %c0_2 = arith.constant 0 : index
    %1 = vector.load %arg2[%c0_1, %c0_2] : memref<8x128xf32, #tpu.memory_space<vmem>>, vector<8x128xf32>
    %2 = vector.broadcast %0 : vector<1x128xf32> to vector<8x128xf32>
    %3 = arith.mulf %1, %2 : vector<8x128xf32>
    %c0_3 = arith.constant 0 : index
    %c0_4 = arith.constant 0 : index
    %4 = vector.load %arg5[%c0_3, %c0_4] : memref<8x128xf32, #tpu.memory_space<vmem>>, vector<8x128xf32>
    tpu.vector_store %arg5[%c0_3, %c0_4], %3 {strides = array<i32>} : memref<8x128xf32, #tpu.memory_space<vmem>>, vector<8x128xf32>,
    %c0_5 = arith.constant 0 : index
    %c0_6 = arith.constant 0 : index
    %5 = vector.load %arg3[%c0_5, %c0_6] : memref<8x128xf32, #tpu.memory_space<vmem>>, vector<8x128xf32>
    %6 = vector.broadcast %0 : vector<1x128xf32> to vector<8x128xf32>
    %7 = arith.mulf %5, %6 : vector<8x128xf32>
    %c0_7 = arith.constant 0 : index
    %c0_8 = arith.constant 0 : index
    %8 = vector.load %arg6[%c0_7, %c0_8] : memref<8x128xf32, #tpu.memory_space<vmem>>, vector<8x128xf32>
    tpu.vector_store %arg6[%c0_7, %c0_8], %7 {strides = array<i32>} : memref<8x128xf32, #tpu.memory_space<vmem>>, vector<8x128xf32>,
    return
  }
  func.func @transform_0(%arg0: i32, %arg1: i32) -> (i32, i32) {
    %c0_i32 = arith.constant 0 : i32
    return %arg0, %arg1 : i32, i32
  }
  func.func @transform_1(%arg0: i32, %arg1: i32) -> (i32, i32) {
    %c0_i32 = arith.constant 0 : i32
    return %arg0, %arg1 : i32, i32
  }
  func.func @transform_2(%arg0: i32, %arg1: i32) -> (i32, i32) {
    %c0_i32 = arith.constant 0 : i32
    %c0_i32_0 = arith.constant 0 : i32
    return %c0_i32, %arg1 : i32, i32
  }
  func.func @transform_3(%arg0: i32, %arg1: i32) -> (i32, i32) {
    %c0_i32 = arith.constant 0 : i32
    return %arg0, %arg1 : i32, i32
  }
  func.func @transform_4(%arg0: i32, %arg1: i32) -> (i32, i32) {
    %c0_i32 = arith.constant 0 : i32
    return %arg0, %arg1 : i32, i32
  }
}

</mosaic_0001>

<bundles_post_ra>
// kernel: tpu_custom_call.1
= control target key start
LH: loop header
LB: loop body
LE: loop exit
PB: predicated region body
PF: predicated region fallthrough
CT: control target
= control target key end

     0   :  { %10 = vsyncpa [#allocation3], 0  ;;  %s222_s0 = inlined_call_operand.hbm [shape: f32[8,128], index: 0, kind: input, shape index: {}]   ;;  %s223_s1 = inlined_call_operand.hbm [shape: f32[8,128], index: 1, kind: input, shape index: {}]   ;;  %s224_s2 = inlined_call_operand.vmem [shape: f32[1,128], index: 2, kind: input, shape index: {}]   ;;  %s225_s3 = inlined_call_operand.hbm [shape: f32[8,128], index: 3, kind: output, shape index: {0}]   ;;  %s226_s4 = inlined_call_operand.hbm [shape: f32[8,128], index: 4, kind: output, shape index: {1}]  }
   0x1   :  { %11 = vsyncpa [#allocation6], 0 }
   0x2   :  { %12 = vsyncpa [#allocation4], 0 }
   0x3   :  { %13 = vsyncpa [#allocation9], 0  ;;  %s178_s15 = smov [#allocation2]   ;;  %s179_s17 = smov [#allocation5]  }
   0x4   :  { %s20_s16 = sshll.u32 %s178_s15, 4  ;;  %s30_s18 = sshll.u32 %s179_s17, 4  ;;  %s21_s16 = int_to_ptr.vmem [resolvable:$true] %s20_s16  ;;  %s31_s18 = int_to_ptr.vmem [resolvable:$true] %s30_s18 }
   0x5   :  { %s98_s19 = scalar_lea.vmem %s21_s16, 128  ;;  %p103_p1 = scmp.lt.s32.totalorder %s21_s16, %s21_s16 }
   0x6   :  { %p99_p0 = scmp.ne.s32.totalorder %s21_s16, %s98_s19  ;;  %p104_p2 = scmp.lt.s32.totalorder %s98_s19, %s98_s19 }
   0x8   :  { %p105_p3 = por %p104_p2, %p103_p1 }
   0xa   :  { %p106_p4 = pnand %p105_p3, %p99_p0 }
   0xc   :  { %109 = shalt.err (!%p106_p4)
}
   0xd   :  { %23 = dma.hbm_to_vmem [thread:$0]  %s222_s0, 128, %s21_s16, [#allocation3]  }
   0xe   :  { %s118_s22 = scalar_lea.vmem %s31_s18, 128  ;;  %p123_p6 = scmp.lt.s32.totalorder %s31_s18, %s31_s18 }
   0xf   :  { %p119_p5 = scmp.ne.s32.totalorder %s31_s18, %s118_s22  ;;  %p124_p7 = scmp.lt.s32.totalorder %s118_s22, %s118_s22 }
  0x11   :  { %p125_p8 = por %p124_p7, %p123_p6 }
  0x13   :  { %p126_p9 = pnand %p125_p8, %p119_p5 }
  0x15   :  { %129 = shalt.err (!%p126_p9)
}
  0x16   :  { %33 = dma.hbm_to_vmem [thread:$0]  %s223_s1, 128, %s31_s18, [#allocation6]  }
  0x17   :  { %170 = dma.done.wait [#allocation3], 128  }
  0x18   :  { %171 = vsyncadd [#allocation3], 4294967168 }
  0x19   :  { %172 = dma.done.wait [#allocation6], 128  }
  0x1a   :  { %173 = vsyncadd [#allocation6], 4294967168  ;;  %s180_s25 = smov [#allocation7]   ;;  %s181_s27 = smov [#allocation8]   ;;  %v85_v0 = vld [vmem:[%s224_s2] ss:$0 sm:$0xff] }
  0x1b   :  { %s61_s26 = sshll.u32 %s180_s25, 4  ;;  %s71_s28 = sshll.u32 %s181_s27, 4  ;;  %v43_v1 = vld [vmem:[#allocation2] sm:$0xff]  ;;  %v52_v2 = vld [vmem:[#allocation5] sm:$0xff]  ;;  %s62_s26 = int_to_ptr.vmem [resolvable:$true] %s61_s26  ;;  %s72_s28 = int_to_ptr.vmem [resolvable:$true] %s71_s28 }
  0x1c   :  { %v50_v3 = vmul.f32 %v85_v0, %v43_v1  ;;  %v53_v4 = vmul.f32 %v85_v0, %v52_v2  ;;  %s130_s1 = scalar_lea.vmem %s62_s26, 128  ;;  %p135_p11 = scmp.lt.s32.totalorder %s62_s26, %s62_s26 }
  0x1d   :  { %p131_p10 = scmp.ne.s32.totalorder %s62_s26, %s130_s1  ;;  %p136_p12 = scmp.lt.s32.totalorder %s130_s1, %s130_s1 }
  0x1e   :  { %51 = vst [vmem:[#allocation7] sm:$0xff] %v50_v3  ;;  %54 = vst [vmem:[#allocation8] sm:$0xff] %v53_v4 }
  0x1f   :  { %p137_p13 = por %p136_p12, %p135_p11 }
  0x21   :  { %p138_p0 = pnand %p137_p13, %p131_p10 }
  0x23   :  { %141 = shalt.err (!%p138_p0)
}
  0x24   :  { %64 = dma.vmem_to_hbm [thread:$0]  %s62_s26, 128, %s225_s3, [#allocation4]  }
  0x25   :  { %s150_s2 = scalar_lea.vmem %s72_s28, 128  ;;  %p155_p2 = scmp.lt.s32.totalorder %s72_s28, %s72_s28 }
  0x26   :  { %p151_p1 = scmp.ne.s32.totalorder %s72_s28, %s150_s2  ;;  %p156_p3 = scmp.lt.s32.totalorder %s150_s2, %s150_s2 }
  0x28   :  { %p157_p4 = por %p156_p3, %p155_p2 }
  0x2a   :  { %p158_p5 = pnand %p157_p4, %p151_p1 }
  0x2c   :  { %161 = shalt.err (!%p158_p5)
}
  0x2d   :  { %74 = dma.vmem_to_hbm [thread:$0]  %s72_s28, 128, %s226_s4, [#allocation9]  }
  0x2e   :  { %174 = dma.done.wait [#allocation4], 128  }
  0x2f   :  { %175 = vsyncadd [#allocation4], 4294967168 }
  0x30   :  { %176 = dma.done.wait [#allocation9], 128  }
  0x31   :  { %177 = vsyncadd [#allocation9], 4294967168 }
  0x32   :  { %81 = vsyncpa [#allocation3], 1 }
  0x33   :  { %82 = vsyncpa [#allocation6], 1 }
  0x34   :  { %83 = vsyncpa [#allocation4], 1 }
  0x35   :  { %84 = vsyncpa [#allocation9], 1 }

</bundles_post_ra>
